<compile_context>
chip_gen: v7x
topology: tpu7x:2x2x1
jax: 0.10.0
libtpu: 0.0.40
codegen_flags: <defaults>
</compile_context>

<pallas_src>
import functools

import numpy as np
import jax
import jax.numpy as jnp
from jax import lax
from jax.experimental import pallas as pl
from jax.experimental.pallas import tpu as pltpu

_LANE = 128
_MAX_ROWS_PER_STEP = 512   # bounds the unrolled 8-row fold (<= 64 VPU adds/step)


def _preprocess_mask(mask_u8):
    """Replicates tools/prnet_loss.py::preprocess on a uint8 grayscale mask."""
    m = np.asarray(mask_u8, dtype=np.uint8).copy()
    pos = m > 0
    m[pos] = m[pos] // 16          # uint8 store of /16, matches torch/numpy in-place
    m[m == 15] = 16
    m[m == 7] = 8
    return m.astype(np.float32)


def _cdiv(a, b):
    return -(-a // b)


def _round_up(x, m):
    return _cdiv(x, m) * m


def _num_tensorcores():
    # v7x has 2 TensorCores per chip; v5e/v6e have 1.
    try:
        kind = jax.devices()[0].device_kind.lower()
        if "v7" in kind:
            return 2
    except Exception:
        pass
    return 1


def _vmem_capacity_bytes():
    # Conservative fallback (v7x physical VMEM) if the query is unavailable.
    try:
        return int(pltpu.get_tpu_info().vmem_capacity_bytes)
    except Exception:
        return 64 * 1024 * 1024


def _weight_mask_loss_kernel(mask_ref, pred_ref, gt_ref, out_ref, acc_ref, *,
                             inv_bc, rows, rt, needs_row_mask):
    # mask_ref: (1, L) f32; pred_ref/gt_ref: (rt, L) native dtype
    # out_ref:  (1, 8, 128) f32 partial-sum slot for this parallel group
    # acc_ref:  (8, L) f32 per-lane accumulator (persists across reduction steps)
    p = pl.program_id(0)
    s = pl.program_id(1)
    n_s = pl.num_programs(1)

    @pl.when(s == 0)
    def _init():
        acc_ref[...] = jnp.zeros_like(acc_ref)

    diff = pred_ref[...].astype(jnp.float32) - gt_ref[...].astype(jnp.float32)
    dsq = diff * diff
    if needs_row_mask:
        # Global row index of each sublane row of this (possibly clamped) tile;
        # out-of-range rows are selected to exact 0 (safe against OOB garbage).
        row_start = (p * n_s + s) * rt
        row_ids = row_start + lax.broadcasted_iota(jnp.int32, (rt, 1), 0)
        dsq = jnp.where(row_ids < rows, dsq, 0.0)

    # Fold the rt rows into the 8-sublane accumulator (pure VPU vreg adds;
    # static 8-row slices are (8,128)-tile aligned).
    upd = dsq[0:8, :]
    for i in range(1, rt // 8):
        upd = upd + dsq[i * 8:(i + 1) * 8, :]
    acc_ref[...] += upd

    @pl.when(s == n_s - 1)
    def _finalize():
        # Mask multiply + single XLU reduce, once per partial-sum group.
        total = jnp.sum(acc_ref[...] * mask_ref[...]) * inv_bc
        out_ref[...] = jnp.full(out_ref.shape, total, dtype=out_ref.dtype)


def weight_mask_loss(pred, gt, mask, *, vmem_budget_bytes=None):
    """pred, gt: (B, C, H, W); mask: (H, W). Returns scalar f32 loss."""
    B, C, H, W = pred.shape
    assert gt.shape == (B, C, H, W)
    assert mask.shape == (H, W)

    rows = B * C
    L = H * W

    # Lane-dense 2D views (free reshapes of contiguous NCHW); native dtype is
    # streamed (bf16 inputs halve HBM reads) and upcast to f32 inside the kernel.
    pred2 = pred.reshape(rows, L)
    gt2 = gt.reshape(rows, L)
    mask2 = mask.astype(jnp.float32).reshape(1, L)

    # Only if there are fewer than 8 rows do we pad to the sublane minimum;
    # zero-padded rows contribute exactly 0 (diff == 0), no masking needed.
    rows_t = rows
    if rows_t < 8:
        pred2 = jnp.pad(pred2, ((0, 8 - rows_t), (0, 0)))
        gt2 = jnp.pad(gt2, ((0, 8 - rows_t), (0, 0)))
        rows_t = 8

    isz = pred2.dtype.itemsize + gt2.dtype.itemsize

    # Per-chip VMEM budget: big tiles on v5e/v6e (128 MiB), capped for v7x (64 MiB).
    vmem_cap = _vmem_capacity_bytes()
    if vmem_budget_bytes is None:
        vmem_budget_bytes = min(48 * 1024 * 1024, vmem_cap // 2)
    vmem_budget_bytes = min(vmem_budget_bytes, vmem_cap - (16 << 20))

    fixed = 2 * L * 4 + 8 * L * 4 + 2 * 8 * _LANE * 4   # mask + acc + out blocks
    stream_budget = max(vmem_budget_bytes - fixed - (2 << 20), 1 << 20)

    # rt rows per grid step: 2 inputs x 2 pipeline buffers each.
    rt = max(8, (stream_budget // (2 * L * isz)) // 8 * 8)
    rt = min(rt, _MAX_ROWS_PER_STEP)

    # P partial-sum groups: one per TensorCore, but only when each group can
    # get at least one full 8-row tile of real data.
    P = min(_num_tensorcores(), max(1, rows_t // 8))

    # Balance groups/steps so no group streams mostly padding, and never let a
    # row block exceed the array's row extent.
    rt = min(rt, _round_up(_cdiv(rows_t, P), 8))
    S = _cdiv(rows_t, P * rt)
    rt = min(rt, _round_up(_cdiv(rows_t, P * S), 8))
    rt = max(8, min(rt, (rows_t // 8) * 8))
    S = _cdiv(rows_t, P * rt)

    last_tile = _cdiv(rows_t, rt) - 1           # last row tile holding real data
    needs_row_mask = (P * S * rt) != rows_t

    if last_tile == P * S - 1:
        def row_tile_map(p, s):
            return (p * S + s, 0)
    else:
        # Clamp fully-out-of-range tiles onto valid data; the in-kernel row
        # mask zeroes their contribution.
        def row_tile_map(p, s):
            return (jnp.minimum(p * S + s, last_tile), 0)

    # Explicit VMEM limit derived from the chosen tiles (+ headroom), kept
    # under the chip's physical VMEM.
    vmem_need = 2 * rt * L * isz + fixed
    vmem_limit = int(min(max(vmem_need + (4 << 20), 16 << 20), vmem_cap - (8 << 20)))

    kernel = functools.partial(
        _weight_mask_loss_kernel,
        inv_bc=float(1.0 / rows), rows=rows_t, rt=rt, needs_row_mask=needs_row_mask)

    partials = pl.pallas_call(
        kernel,
        out_shape=jax.ShapeDtypeStruct((P, 8, _LANE), jnp.float32),
        grid_spec=pltpu.PrefetchScalarGridSpec(
            num_scalar_prefetch=0,
            grid=(P, S),
            in_specs=[
                pl.BlockSpec((1, L), lambda p, s: (0, 0)),
                pl.BlockSpec((rt, L), row_tile_map),
                pl.BlockSpec((rt, L), row_tile_map),
            ],
            out_specs=pl.BlockSpec((1, 8, _LANE), lambda p, s: (p, 0, 0)),
            scratch_shapes=[pltpu.VMEM((8, L), jnp.float32)],
        ),
        compiler_params=pltpu.CompilerParams(
            dimension_semantics=("parallel", "arbitrary"),
            vmem_limit_bytes=vmem_limit,
        ),
    )(mask2, pred2, gt2)

    # Sum the P per-group partials (each already scaled by 1/(B*C)).
    return jnp.sum(partials[:, 0, 0])


if __name__ == "__main__":
    # Small shapes consistent with the module's forward: NCHW pred/gt, (H, W) mask.
    B, C, H, W = 2, 4, 16, 16

    key = jax.random.PRNGKey(0)
    k_pred, k_gt, k_mask = jax.random.split(key, 3)

    pred = jax.random.normal(k_pred, (B, C, H, W), dtype=jnp.float32)
    gt = jax.random.normal(k_gt, (B, C, H, W), dtype=jnp.float32)

    # Synthetic deterministic "grayscale mask image" (stands in for cv2.imread),
    # then the module's preprocess() applied to it.
    # TODO(synk): production loads the mask from disk via cv2.imread(mask_path, 0).
    raw_mask = np.asarray(
        jax.random.randint(k_mask, (H, W), 0, 256, dtype=jnp.int32)
    ).astype(np.uint8)
    mask = jnp.asarray(_preprocess_mask(raw_mask))

    loss = weight_mask_loss(pred, gt, mask)
    loss = jax.block_until_ready(loss)

    # Pure-JAX reference for correctness.
    ref = jnp.sum(jnp.mean(jnp.mean((pred - gt) ** 2, axis=1) * mask[None], axis=0))
    np.testing.assert_allclose(np.asarray(loss), np.asarray(ref), rtol=1e-5, atol=1e-5)

    print("KERNEL_OK")
</pallas_src>

<mosaic_0001>
module attributes {stable_mosaic.version = 11 : i64} {
  func.func @_weight_mask_loss_kernel(%arg0: i32, %arg1: i32, %arg2: memref<1x256xf32, #tpu.memory_space<vmem>>, %arg3: memref<8x256xf32, #tpu.memory_space<vmem>>, %arg4: memref<8x256xf32, #tpu.memory_space<vmem>>, %arg5: memref<1x8x128xf32, #tpu.memory_space<vmem>>, %arg6: memref<8x256xf32, #tpu.memory_space<vmem>>) attributes {dimension_semantics = [#tpu.dimension_semantics<parallel>, #tpu.dimension_semantics<arbitrary>], iteration_bounds = array<i64: 1, 1>, scalar_prefetch = 0 : i64, scratch_operands = 1 : i64, tpu.core_type = #tpu.core_type<tc>, window_params = [{pipeline_mode = #tpu.pipeline_mode<synchronous>, transform_indices = @transform_0, window_bounds = array<i64: 1, 256>}, {transform_indices = @transform_1, window_bounds = array<i64: 8, 256>}, {transform_indices = @transform_2, window_bounds = array<i64: 8, 256>}, {transform_indices = @transform_3, window_bounds = array<i64: 1, 8, 128>}]} {
    %c0_i32 = arith.constant 0 : i32
    %0 = arith.cmpi eq, %arg1, %c0_i32 : i32
    %1 = arith.extui %0 : i1 to i32
    %c0_i32_0 = arith.constant 0 : i32
    %2 = arith.cmpi ne, %1, %c0_i32_0 : i32
    scf.if %2 {
      %cst = arith.constant 0.000000e+00 : f32
      %13 = vector.broadcast %cst : f32 to vector<8x256xf32>
      %c0_10 = arith.constant 0 : index
      %c0_11 = arith.constant 0 : index
      %14 = vector.load %arg6[%c0_10, %c0_11] : memref<8x256xf32, #tpu.memory_space<vmem>>, vector<8x256xf32>
      tpu.vector_store %arg6[%c0_10, %c0_11], %13 {strides = array<i32>} : memref<8x256xf32, #tpu.memory_space<vmem>>, vector<8x256xf32>,
    } else {
    }
    %c0 = arith.constant 0 : index
    %c0_1 = arith.constant 0 : index
    %3 = vector.load %arg3[%c0, %c0_1] : memref<8x256xf32, #tpu.memory_space<vmem>>, vector<8x256xf32>
    %c0_2 = arith.constant 0 : index
    %c0_3 = arith.constant 0 : index
    %4 = vector.load %arg4[%c0_2, %c0_3] : memref<8x256xf32, #tpu.memory_space<vmem>>, vector<8x256xf32>
    %5 = arith.subf %3, %4 : vector<8x256xf32>
    %6 = arith.mulf %5, %5 : vector<8x256xf32>
    %c0_4 = arith.constant 0 : index
    %c0_5 = arith.constant 0 : index
    %7 = vector.load %arg6[%c0_4, %c0_5] : memref<8x256xf32, #tpu.memory_space<vmem>>, vector<8x256xf32>
    %8 = arith.addf %7, %6 : vector<8x256xf32>
    %c0_6 = arith.constant 0 : index
    %c0_7 = arith.constant 0 : index
    %9 = vector.load %arg6[%c0_6, %c0_7] : memref<8x256xf32, #tpu.memory_space<vmem>>, vector<8x256xf32>
    tpu.vector_store %arg6[%c0_6, %c0_7], %8 {strides = array<i32>} : memref<8x256xf32, #tpu.memory_space<vmem>>, vector<8x256xf32>,
    %c0_i32_8 = arith.constant 0 : i32
    %10 = arith.cmpi eq, %arg1, %c0_i32_8 : i32
    %11 = arith.extui %10 : i1 to i32
    %c0_i32_9 = arith.constant 0 : i32
    %12 = arith.cmpi ne, %11, %c0_i32_9 : i32
    scf.if %12 {
      %c0_10 = arith.constant 0 : index
      %c0_11 = arith.constant 0 : index
      %13 = vector.load %arg6[%c0_10, %c0_11] : memref<8x256xf32, #tpu.memory_space<vmem>>, vector<8x256xf32>
      %c0_12 = arith.constant 0 : index
      %c0_13 = arith.constant 0 : index
      %14 = vector.load %arg2[%c0_12, %c0_13] : memref<1x256xf32, #tpu.memory_space<vmem>>, vector<1x256xf32>
      %15 = vector.broadcast %14 : vector<1x256xf32> to vector<8x256xf32>
      %16 = arith.mulf %13, %15 : vector<8x256xf32>
      %17 = vector.shape_cast %16 : vector<8x256xf32> to vector<1x8x256xf32>
      %cst = arith.constant dense<0.000000e+00> : vector<1xf32>
      %18 = vector.multi_reduction <add>, %17, %cst [1, 2] : vector<1x8x256xf32> to vector<1xf32>
      %19 = vector.shape_cast %18 : vector<1xf32> to vector<1x1x1xf32>
      %20 = vector.extract %19[0, 0, 0] : f32 from vector<1x1x1xf32>
      %cst_14 = arith.constant 1.250000e-01 : f32
      %21 = arith.mulf %20, %cst_14 : f32
      %22 = vector.broadcast %21 : f32 to vector<1x8x128xf32>
      %c0_15 = arith.constant 0 : index
      %c0_16 = arith.constant 0 : index
      %c0_17 = arith.constant 0 : index
      %23 = vector.load %arg5[%c0_15, %c0_16, %c0_17] : memref<1x8x128xf32, #tpu.memory_space<vmem>>, vector<1x8x128xf32>
      tpu.vector_store %arg5[%c0_15, %c0_16, %c0_17], %22 {strides = array<i32>} : memref<1x8x128xf32, #tpu.memory_space<vmem>>, vector<1x8x128xf32>,
    } else {
    }
    return
  }
  func.func @transform_0(%arg0: i32, %arg1: i32) -> (i32, i32) {
    %c0_i32 = arith.constant 0 : i32
    %c0_i32_0 = arith.constant 0 : i32
    %c0_i32_1 = arith.constant 0 : i32
    return %c0_i32, %c0_i32_0 : i32, i32
  }
  func.func @transform_1(%arg0: i32, %arg1: i32) -> (i32, i32) {
    %c1_i32 = arith.constant 1 : i32
    %0 = arith.muli %arg0, %c1_i32 : i32
    %1 = arith.addi %0, %arg1 : i32
    %c0_i32 = arith.constant 0 : i32
    %c0_i32_0 = arith.constant 0 : i32
    return %1, %c0_i32 : i32, i32
  }
  func.func @transform_2(%arg0: i32, %arg1: i32) -> (i32, i32) {
    %c1_i32 = arith.constant 1 : i32
    %0 = arith.muli %arg0, %c1_i32 : i32
    %1 = arith.addi %0, %arg1 : i32
    %c0_i32 = arith.constant 0 : i32
    %c0_i32_0 = arith.constant 0 : i32
    return %1, %c0_i32 : i32, i32
  }
  func.func @transform_3(%arg0: i32, %arg1: i32) -> (i32, i32, i32) {
    %c0_i32 = arith.constant 0 : i32
    %c0_i32_0 = arith.constant 0 : i32
    %c0_i32_1 = arith.constant 0 : i32
    return %arg0, %c0_i32, %c0_i32_0 : i32, i32, i32
  }
}

</mosaic_0001>

<bundles_post_ra>
// kernel: tpu_custom_call.1
= control target key start
LH: loop header
LB: loop body
LE: loop exit
PB: predicated region body
PF: predicated region fallthrough
CT: control target
= control target key end

     0   :  { %8 = vsyncpa [#allocation4], 0  ;;  %s300_s0 = inlined_call_operand.hbm [shape: f32[1,256], index: 0, kind: input, shape index: {}]   ;;  %s301_s1 = inlined_call_operand.hbm [shape: f32[8,256], index: 1, kind: input, shape index: {}]   ;;  %s302_s2 = inlined_call_operand.hbm [shape: f32[8,256], index: 2, kind: input, shape index: {}]   ;;  %s303_s3 = inlined_call_operand.hbm [shape: f32[1,8,128], index: 3, kind: output, shape index: {}]  }
   0x1   :  { %9 = vsyncpa [#allocation7], 0 }
   0x2   :  { %10 = vsyncpa [#allocation5], 0  ;;  %s228_s12 = smov [#allocation6]   ;;  %s229_s14 = smov [#allocation3]  }
   0x3   :  { %s31_s13 = sshll.u32 %s228_s12, 4  ;;  %s17_s15 = sshll.u32 %s229_s14, 4  ;;  %s32_s13 = int_to_ptr.vmem [resolvable:$true] %s31_s13  ;;  %s18_s15 = int_to_ptr.vmem [resolvable:$true] %s17_s15 }
   0x4   :  { %s134_s18 = scalar_lea.hbm %s301_s1, 256 }
   0x5   :  { %p135_p0 = scmp.ne.s32.totalorder %s301_s1, %s134_s18  ;;  %p138_p1 = scmp.lt.u32.totalorder %s134_s18, %s301_s1 }
   0x7   :  { %p140_p2 = pnand %p138_p1, %p135_p0 }
   0x9   :  { %143 = shalt.err (!%p140_p2)
}
   0xa   :  { %s144_s23 = scalar_lea.vmem %s32_s13, 256  ;;  %p149_p4 = scmp.lt.s32.totalorder %s32_s13, %s32_s13 }
   0xb   :  { %p145_p3 = scmp.ne.s32.totalorder %s32_s13, %s144_s23  ;;  %p150_p5 = scmp.lt.s32.totalorder %s144_s23, %s144_s23 }
   0xd   :  { %p151_p6 = por %p150_p5, %p149_p4 }
   0xf   :  { %p152_p7 = pnand %p151_p6, %p145_p3 }
  0x11   :  { %155 = shalt.err (!%p152_p7)
}
  0x12   :  { %34 = dma.hbm_to_vmem [thread:$0]  %s301_s1, 256, %s32_s13, [#allocation7]  }
  0x13   :  { %s156_s28 = scalar_lea.hbm %s300_s0, 32 }
  0x14   :  { %p157_p8 = scmp.ne.s32.totalorder %s300_s0, %s156_s28  ;;  %p160_p9 = scmp.lt.u32.totalorder %s156_s28, %s300_s0 }
  0x16   :  { %p162_p10 = pnand %p160_p9, %p157_p8 }
  0x18   :  { %165 = shalt.err (!%p162_p10)
}
  0x19   :  { %s166_s6 = scalar_lea.vmem %s18_s15, 32  ;;  %p171_p12 = scmp.lt.s32.totalorder %s18_s15, %s18_s15 }
  0x1a   :  { %p167_p11 = scmp.ne.s32.totalorder %s18_s15, %s166_s6  ;;  %p172_p13 = scmp.lt.s32.totalorder %s166_s6, %s166_s6 }
  0x1c   :  { %p173_p0 = por %p172_p13, %p171_p12 }
  0x1e   :  { %p174_p1 = pnand %p173_p0, %p167_p11 }
  0x20   :  { %177 = shalt.err (!%p174_p1)
}
  0x21   :  { %20 = dma.hbm_to_vmem [thread:$0]  %s300_s0, 32, %s18_s15, [#allocation4]  }
  0x22   :  { %s230_s8 = smov [#allocation8]   ;;  %s178_s12 = scalar_lea.hbm %s302_s2, 256 }
  0x23   :  { %s45_s9 = sshll.u32 %s230_s8, 4  ;;  %p179_p2 = scmp.ne.s32.totalorder %s302_s2, %s178_s12  ;;  %s46_s9 = int_to_ptr.vmem [resolvable:$true] %s45_s9 }
  0x24   :  { %p182_p3 = scmp.lt.u32.totalorder %s178_s12, %s302_s2 }
  0x26   :  { %p184_p4 = pnand %p182_p3, %p179_p2 }
  0x28   :  { %187 = shalt.err (!%p184_p4)
}
  0x29   :  { %s188_s18 = scalar_lea.vmem %s46_s9, 256  ;;  %p193_p6 = scmp.lt.s32.totalorder %s46_s9, %s46_s9 }
  0x2a   :  { %p189_p5 = scmp.ne.s32.totalorder %s46_s9, %s188_s18  ;;  %p194_p7 = scmp.lt.s32.totalorder %s188_s18, %s188_s18 }
  0x2c   :  { %p195_p8 = por %p194_p7, %p193_p6 }
  0x2e   :  { %p196_p9 = pnand %p195_p8, %p189_p5 }
  0x30   :  { %199 = shalt.err (!%p196_p9)
}
  0x31   :  { %48 = dma.hbm_to_vmem [thread:$0]  %s302_s2, 256, %s46_s9, [#allocation7]  }
  0x32   :  { %222 = dma.done.wait [#allocation4], 32  }
  0x33   :  { %223 = vsyncadd [#allocation4], 4294967264 }
  0x34   :  { %224 = dma.done.wait [#allocation7], 512  }
  0x35   :  { %225 = vsyncadd [#allocation7], 4294966784  ;;  %v87_v0 = vlaneseq  ;;  %v66_v4 = vld [vmem:[#allocation6] sm:$0xff]  ;;  %v67_v5 = vld [vmem:[#allocation6 + $0x8] sm:$0xff]  ;;  %s231_s2 = smov [#allocation9]  }
  0x36   :  { %v68_v6 = vld [vmem:[#allocation8] sm:$0xff]  ;;  %v69_v7 = vld [vmem:[#allocation8 + $0x8] sm:$0xff]  ;;  %s118_s19 = sshll.u32 %s231_s2, 4  ;;  %s119_s19 = int_to_ptr.vmem [resolvable:$true] %s118_s19 }
  0x37   :  { %v88_v1 = vshrl.u32 %v87_v0, 7  ;;  %v70_v8 = vsub.f32 %v66_v4, %v68_v6  ;;  %v85_v9 = vld [vmem:[#allocation3] sm:$0x3]  ;;  %v71_v10 = vsub.f32 %v67_v5, %v69_v7  ;;  %s200_s22 = scalar_lea.vmem %s119_s19, 128  ;;  %p205_p11 = scmp.lt.s32.totalorder %s119_s19, %s119_s19 }
  0x38   :  { %p201_p10 = scmp.ne.s32.totalorder %s119_s19, %s200_s22  ;;  %p206_p12 = scmp.lt.s32.totalorder %s200_s22, %s200_s22 }
  0x39   :  { %v89_v2 = vsub.s32 0, %v88_v1  ;;  %v93_v3 = vsub.s32 1, %v88_v1  ;;  %v72_v13 = vmul.f32 %v70_v8, %v70_v8  ;;  %v73_v14 = vmul.f32 %v71_v10, %v71_v10 }
  0x3a   :  { %p207_p13 = por %p206_p12, %p205_p11 }
  0x3b   :  { %v90_v11 = vrot.slane %v85_v9, %v89_v2  ;;  %v94_v12 = vrot.slane %v85_v9, %v93_v3 }
  0x3c   :  { %p208_p0 = pnand %p207_p13, %p201_p10 }
  0x3d   :  { %v97_v15 = vmul.f32 %v90_v11, %v72_v13  ;;  %v98_v16 = vmul.f32 %v94_v12, %v73_v14 }
  0x3f   :  { %v99_v17 = vadd.f32 %v98_v16, %v97_v15 }
  0x41   :  { %100 = vadd.xlane.f32.xlu0 %v99_v17 }
  0xce   :  { %v101_v18 = vpop.xlane.xlu0 %100 }
  0xcf   :  { %v102_v19 = vrot.slane %v101_v18, 4 }
  0xd1   :  { %v103_v20 = vadd.f32 %v102_v19, %v101_v18 }
  0xd3   :  { %v104_v21 = vrot.slane %v103_v20, 2 }
  0xd5   :  { %v105_v22 = vadd.f32 %v104_v21, %v103_v20 }
  0xd7   :  { %v106_v23 = vrot.slane %v105_v22, 1 }
  0xd9   :  { %v107_v24 = vadd.f32 %v106_v23, %v105_v22 }
  0xdb   :  { %128 = vpush %v107_v24 }
 0x10c   :  { %s129_s20 = spop %128 }
 0x10d   :  { %s109_s21 = smul.f32 0.125, %s129_s20 }
 0x10f   :  { %v110_v25 = vstv %s109_s21 }
 0x110   :  { %111 = vst [vmem:[#allocation9] sm:$0xff] %v110_v25 }
 0x111   :  { %211 = shalt.err (!%p208_p0)
}
 0x112   :  { %s212_s25 = scalar_lea.hbm %s303_s3, 128 }
 0x113   :  { %p213_p1 = scmp.ne.s32.totalorder %s303_s3, %s212_s25  ;;  %p216_p2 = scmp.lt.u32.totalorder %s212_s25, %s303_s3 }
 0x115   :  { %p218_p3 = pnand %p216_p2, %p213_p1 }
 0x117   :  { %221 = shalt.err (!%p218_p3)
}
 0x118   :  { %121 = dma.vmem_to_hbm [thread:$0]  %s119_s19, 128, %s303_s3, [#allocation5]  }
 0x119   :  { %226 = dma.done.wait [#allocation5], 128  }
 0x11a   :  { %227 = vsyncadd [#allocation5], 4294967168 }
 0x11b   :  { %125 = vsyncpa [#allocation4], 1 }
 0x11c   :  { %126 = vsyncpa [#allocation7], 1 }
 0x11d   :  { %127 = vsyncpa [#allocation5], 1 }

</bundles_post_ra>
